<compile_context>
chip_gen: v6e
topology: v6e:2x2x1
jax: 0.10.0
libtpu: 0.0.40
codegen_flags: <defaults>
</compile_context>

<pallas_src>
import functools

import jax
import jax.numpy as jnp
from jax.experimental import pallas as pl
from jax.experimental.pallas import tpu as pltpu


def _round_up(n: int, m: int) -> int:
    return ((n + m - 1) // m) * m


def _dynamics_kernel(xT_ref, w1T_ref, b1_ref, w2T_ref, b2_ref, m_ref, outT_ref,
                     *, relaxed: bool, alpha: float):
    """Feature-major kernel: all operands are (features, batch_tile)."""
    xT = xT_ref[...]                                                     # (D, TB)

    # ---- fhat(x)^T : 2-layer MLP with tanh ----------------------------------
    h = jnp.tanh(
        jnp.dot(w1T_ref[...], xT, preferred_element_type=jnp.float32)   # (H, TB)
        + b1_ref[...]
    )
    fx = (jnp.dot(w2T_ref[...], h, preferred_element_type=jnp.float32)  # (D, TB)
          + b2_ref[...])

    # ---- grad V(x)^T = (wv wv^T) @ x^T  (wv wv^T pre-folded into M) ---------
    gV = jnp.dot(m_ref[...], xT, preferred_element_type=jnp.float32)    # (D, TB)

    # ---- stability projection (per-column reductions over feature axis) -----
    dot_gf = jnp.sum(gV * fx, axis=0, keepdims=True)                    # (1, TB)
    if relaxed:
        num = jnp.maximum(dot_gf, 0.0)
    else:
        # V(x) = 0.5*||x wv||^2 = 0.5 * x (wv wv^T) x^T = 0.5 * sum(x*gV)
        vx = 0.5 * jnp.sum(xT * gV, axis=0, keepdims=True)
        num = jnp.maximum(dot_gf + alpha * vx, 0.0)
    den = jnp.sum(gV * gV, axis=0, keepdims=True)                       # (1, TB)

    # Exact reciprocal keeps parity with the reference num/den + nan_to_num;
    # den == 0 -> 0 * inf = nan -> nan_to_num -> 0 (same as PyTorch).
    ratio = num * pl.reciprocal(den, approx=False)
    rv = fx - gV * ratio
    outT_ref[...] = jnp.nan_to_num(rv).astype(outT_ref.dtype)


def dynamics_forward(x, params, *, relaxed: bool = True, alpha: float = 0.01,
                     batch_tile: int = 512):
    """Pallas wrapper: batch-tiled grid, resident weights, lane-dense batch axis."""
    w1, b1, w2, b2, wv = params
    B, D = x.shape
    H = w1.shape[1]

    # Batch tile: multiple of 128 lanes (and trivially under VMEM at D=4/H=32).
    tb = min(batch_tile, _round_up(B, 128))
    Bp = _round_up(B, tb)

    # Layout plumbing: feature-major so the batch axis maps to lanes.
    xT = x.T                                     # (D, B)
    if Bp != B:
        xT = jnp.pad(xT, ((0, 0), (0, Bp - B)))  # zero columns -> sliced off below

    w1T = w1.T                                   # (H, D)
    b1c = jnp.reshape(b1, (H, 1))                # (H, 1)
    w2T = w2.T                                   # (D, H)
    b2c = jnp.reshape(b2, (D, 1))                # (D, 1)
    M = wv @ wv.T                                # (D, D): gV = M @ x^T, single matmul

    kernel = functools.partial(_dynamics_kernel, relaxed=relaxed, alpha=alpha)
    const = lambda i: (0, 0)                     # weights stay resident across grid

    outT = pl.pallas_call(
        kernel,
        out_shape=jax.ShapeDtypeStruct((D, Bp), jnp.float32),
        grid=(Bp // tb,),
        in_specs=[
            pl.BlockSpec((D, tb), lambda i: (0, i)),   # x^T      (batch-tiled)
            pl.BlockSpec((H, D), const),               # w1^T     (resident)
            pl.BlockSpec((H, 1), const),               # b1       (resident)
            pl.BlockSpec((D, H), const),               # w2^T     (resident)
            pl.BlockSpec((D, 1), const),               # b2       (resident)
            pl.BlockSpec((D, D), const),               # wv wv^T  (resident)
        ],
        out_specs=pl.BlockSpec((D, tb), lambda i: (0, i)),
        compiler_params=pltpu.CompilerParams(
            dimension_semantics=("parallel",),         # megacore shard on v7x
            vmem_limit_bytes=32 * 1024 * 1024,         # portable v5e/v6e/v7x budget
        ),
    )(xT, w1T, b1c, w2T, b2c, M)

    return outT[:, :B].T                          # back to (B, D)


def dynamics_reference(x, params, *, relaxed: bool = True, alpha: float = 0.01):
    """Pure-JAX reference mirroring the PyTorch forward semantics."""
    w1, b1, w2, b2, wv = params
    fx = jnp.tanh(x @ w1 + b1) @ w2 + b2
    z = x @ wv
    gV = z @ wv.T                    # analytic autograd grad of V(x)=0.5||x wv||^2
    dot_gf = jnp.sum(gV * fx, axis=1)
    if relaxed:
        num = jax.nn.relu(dot_gf)
    else:
        Vx = 0.5 * jnp.sum(z * z, axis=1)
        num = jax.nn.relu(dot_gf + alpha * Vx)
    den = jnp.sum(gV * gV, axis=1)
    rv = fx - gV * (num / den)[:, None]
    return jnp.nan_to_num(rv)


def init_params(key, dim, hidden, vdim):
    k1, k2, k3 = jax.random.split(key, 3)
    w1 = jax.random.normal(k1, (dim, hidden), jnp.float32) * 0.3
    b1 = jnp.zeros((1, hidden), jnp.float32)
    w2 = jax.random.normal(k2, (hidden, dim), jnp.float32) * 0.3
    b2 = jnp.zeros((1, dim), jnp.float32)
    wv = jax.random.normal(k3, (dim, vdim), jnp.float32) * 0.5
    return (w1, b1, w2, b2, wv)


if __name__ == "__main__":
    key = jax.random.PRNGKey(0)
    kx, kp = jax.random.split(key)

    B, D, H, K = 256, 4, 32, 8        # batch, state dim, fhat hidden, V feature dim
    x = jax.random.normal(kx, (B, D), jnp.float32)
    params = init_params(kp, D, H, K)

    # relaxed path (default PyTorch config); batch_tile=128 -> 2-step grid
    out = jax.block_until_ready(dynamics_forward(x, params, relaxed=True,
                                                 batch_tile=128))
    ref = dynamics_reference(x, params, relaxed=True)
    assert out.shape == (B, D)
    assert jnp.allclose(out, ref, rtol=1e-4, atol=1e-4), "relaxed path mismatch"

    # non-relaxed path (exercises the alpha*V(x) term via 0.5*sum(x*gV))
    out2 = jax.block_until_ready(dynamics_forward(x, params, relaxed=False,
                                                  alpha=0.01, batch_tile=128))
    ref2 = dynamics_reference(x, params, relaxed=False, alpha=0.01)
    assert jnp.allclose(out2, ref2, rtol=1e-4, atol=1e-4), "non-relaxed path mismatch"

    print("KERNEL_OK")
</pallas_src>

<mosaic_0001>
module attributes {stable_mosaic.version = 11 : i64} {
  func.func @_dynamics_kernel(%arg0: i32, %arg1: memref<4x128xf32, #tpu.memory_space<vmem>>, %arg2: memref<32x4xf32, #tpu.memory_space<vmem>>, %arg3: memref<32x1xf32, #tpu.memory_space<vmem>>, %arg4: memref<4x32xf32, #tpu.memory_space<vmem>>, %arg5: memref<4x1xf32, #tpu.memory_space<vmem>>, %arg6: memref<4x4xf32, #tpu.memory_space<vmem>>, %arg7: memref<4x128xf32, #tpu.memory_space<vmem>>) attributes {dimension_semantics = [#tpu.dimension_semantics<parallel>], iteration_bounds = array<i64: 2>, scalar_prefetch = 0 : i64, scratch_operands = 0 : i64, tpu.core_type = #tpu.core_type<tc>, window_params = [{transform_indices = @transform_0, window_bounds = array<i64: 4, 128>}, {pipeline_mode = #tpu.pipeline_mode<synchronous>, transform_indices = @transform_1, window_bounds = array<i64: 32, 4>}, {pipeline_mode = #tpu.pipeline_mode<synchronous>, transform_indices = @transform_2, window_bounds = array<i64: 32, 1>}, {pipeline_mode = #tpu.pipeline_mode<synchronous>, transform_indices = @transform_3, window_bounds = array<i64: 4, 32>}, {pipeline_mode = #tpu.pipeline_mode<synchronous>, transform_indices = @transform_4, window_bounds = array<i64: 4, 1>}, {pipeline_mode = #tpu.pipeline_mode<synchronous>, transform_indices = @transform_5, window_bounds = array<i64: 4, 4>}, {transform_indices = @transform_6, window_bounds = array<i64: 4, 128>}]} {
    %c0 = arith.constant 0 : index
    %c0_0 = arith.constant 0 : index
    %0 = vector.load %arg1[%c0, %c0_0] : memref<4x128xf32, #tpu.memory_space<vmem>>, vector<4x128xf32>
    %c0_1 = arith.constant 0 : index
    %c0_2 = arith.constant 0 : index
    %1 = vector.load %arg2[%c0_1, %c0_2] : memref<32x4xf32, #tpu.memory_space<vmem>>, vector<32x4xf32>
    %cst = arith.constant dense<0.000000e+00> : vector<32x128xf32>
    %2 = tpu.matmul %1, %0, %cst {dimension_numbers = #tpu.dot_dimension_numbers<[1], [0], [0], [1], [0, 0, 1, 1], [], []>} : vector<32x4xf32>, vector<4x128xf32>, vector<32x128xf32> -> vector<32x128xf32>
    %c0_3 = arith.constant 0 : index
    %c0_4 = arith.constant 0 : index
    %3 = vector.load %arg3[%c0_3, %c0_4] : memref<32x1xf32, #tpu.memory_space<vmem>>, vector<32x1xf32>
    %4 = vector.broadcast %3 : vector<32x1xf32> to vector<32x128xf32>
    %5 = arith.addf %2, %4 : vector<32x128xf32>
    %6 = math.tanh %5 : vector<32x128xf32>
    %c0_5 = arith.constant 0 : index
    %c0_6 = arith.constant 0 : index
    %7 = vector.load %arg4[%c0_5, %c0_6] : memref<4x32xf32, #tpu.memory_space<vmem>>, vector<4x32xf32>
    %cst_7 = arith.constant dense<0.000000e+00> : vector<4x128xf32>
    %8 = tpu.matmul %7, %6, %cst_7 {dimension_numbers = #tpu.dot_dimension_numbers<[1], [0], [0], [1], [0, 0, 1, 1], [], []>} : vector<4x32xf32>, vector<32x128xf32>, vector<4x128xf32> -> vector<4x128xf32>
    %c0_8 = arith.constant 0 : index
    %c0_9 = arith.constant 0 : index
    %9 = vector.load %arg5[%c0_8, %c0_9] : memref<4x1xf32, #tpu.memory_space<vmem>>, vector<4x1xf32>
    %10 = vector.broadcast %9 : vector<4x1xf32> to vector<4x128xf32>
    %11 = arith.addf %8, %10 : vector<4x128xf32>
    %c0_10 = arith.constant 0 : index
    %c0_11 = arith.constant 0 : index
    %12 = vector.load %arg6[%c0_10, %c0_11] : memref<4x4xf32, #tpu.memory_space<vmem>>, vector<4x4xf32>
    %cst_12 = arith.constant dense<0.000000e+00> : vector<4x128xf32>
    %13 = tpu.matmul %12, %0, %cst_12 {dimension_numbers = #tpu.dot_dimension_numbers<[1], [0], [0], [1], [0, 0, 1, 1], [], []>} : vector<4x4xf32>, vector<4x128xf32>, vector<4x128xf32> -> vector<4x128xf32>
    %14 = arith.mulf %13, %11 : vector<4x128xf32>
    %cst_13 = arith.constant dense<0.000000e+00> : vector<128xf32>
    %15 = vector.multi_reduction <add>, %14, %cst_13 [0] : vector<4x128xf32> to vector<128xf32>
    %16 = vector.shape_cast %15 : vector<128xf32> to vector<1x128xf32>
    %cst_14 = arith.constant 0.000000e+00 : f32
    %17 = vector.broadcast %cst_14 : f32 to vector<1x128xf32>
    %18 = arith.maximumf %16, %17 : vector<1x128xf32>
    %19 = arith.mulf %13, %13 : vector<4x128xf32>
    %cst_15 = arith.constant dense<0.000000e+00> : vector<128xf32>
    %20 = vector.multi_reduction <add>, %19, %cst_15 [0] : vector<4x128xf32> to vector<128xf32>
    %21 = vector.shape_cast %20 : vector<128xf32> to vector<1x128xf32>
    %22 = tpu.reciprocal %21 : vector<1x128xf32> -> vector<1x128xf32>
    %23 = arith.mulf %18, %22 : vector<1x128xf32>
    %24 = vector.broadcast %23 : vector<1x128xf32> to vector<4x128xf32>
    %25 = arith.mulf %13, %24 : vector<4x128xf32>
    %26 = arith.subf %11, %25 : vector<4x128xf32>
    %27 = arith.cmpf one, %26, %26 : vector<4x128xf32>
    %cst_16 = arith.constant 0.000000e+00 : f32
    %28 = vector.broadcast %cst_16 : f32 to vector<4x128xf32>
    %29 = arith.select %27, %28, %26 : vector<4x128xi1>, vector<4x128xf32>
    %cst_17 = arith.constant 0x7F800000 : f32
    %30 = vector.broadcast %cst_17 : f32 to vector<4x128xf32>
    %31 = arith.cmpf oeq, %29, %30 : vector<4x128xf32>
    %cst_18 = arith.constant 3.40282347E+38 : f32
    %32 = vector.broadcast %cst_18 : f32 to vector<4x128xf32>
    %33 = arith.select %31, %32, %29 : vector<4x128xi1>, vector<4x128xf32>
    %cst_19 = arith.constant 0xFF800000 : f32
    %34 = vector.broadcast %cst_19 : f32 to vector<4x128xf32>
    %35 = arith.cmpf oeq, %33, %34 : vector<4x128xf32>
    %cst_20 = arith.constant -3.40282347E+38 : f32
    %36 = vector.broadcast %cst_20 : f32 to vector<4x128xf32>
    %37 = arith.select %35, %36, %33 : vector<4x128xi1>, vector<4x128xf32>
    %c0_21 = arith.constant 0 : index
    %c0_22 = arith.constant 0 : index
    %38 = vector.load %arg7[%c0_21, %c0_22] : memref<4x128xf32, #tpu.memory_space<vmem>>, vector<4x128xf32>
    tpu.vector_store %arg7[%c0_21, %c0_22], %37 {strides = array<i32>} : memref<4x128xf32, #tpu.memory_space<vmem>>, vector<4x128xf32>,
    return
  }
  func.func @transform_0(%arg0: i32) -> (i32, i32) {
    %c0_i32 = arith.constant 0 : i32
    %c0_i32_0 = arith.constant 0 : i32
    return %c0_i32, %arg0 : i32, i32
  }
  func.func @transform_1(%arg0: i32) -> (i32, i32) {
    %c0_i32 = arith.constant 0 : i32
    %c0_i32_0 = arith.constant 0 : i32
    %c0_i32_1 = arith.constant 0 : i32
    return %c0_i32, %c0_i32_0 : i32, i32
  }
  func.func @transform_2(%arg0: i32) -> (i32, i32) {
    %c0_i32 = arith.constant 0 : i32
    %c0_i32_0 = arith.constant 0 : i32
    %c0_i32_1 = arith.constant 0 : i32
    return %c0_i32, %c0_i32_0 : i32, i32
  }
  func.func @transform_3(%arg0: i32) -> (i32, i32) {
    %c0_i32 = arith.constant 0 : i32
    %c0_i32_0 = arith.constant 0 : i32
    %c0_i32_1 = arith.constant 0 : i32
    return %c0_i32, %c0_i32_0 : i32, i32
  }
  func.func @transform_4(%arg0: i32) -> (i32, i32) {
    %c0_i32 = arith.constant 0 : i32
    %c0_i32_0 = arith.constant 0 : i32
    %c0_i32_1 = arith.constant 0 : i32
    return %c0_i32, %c0_i32_0 : i32, i32
  }
  func.func @transform_5(%arg0: i32) -> (i32, i32) {
    %c0_i32 = arith.constant 0 : i32
    %c0_i32_0 = arith.constant 0 : i32
    %c0_i32_1 = arith.constant 0 : i32
    return %c0_i32, %c0_i32_0 : i32, i32
  }
  func.func @transform_6(%arg0: i32) -> (i32, i32) {
    %c0_i32 = arith.constant 0 : i32
    %c0_i32_0 = arith.constant 0 : i32
    return %c0_i32, %arg0 : i32, i32
  }
}

</mosaic_0001>

<bundles_post_ra>
// kernel: tpu_custom_call.1
= control target key start
LH: loop header
LB: loop body
LE: loop exit
PB: predicated region body
PF: predicated region fallthrough
CT: control target
= control target key end

     0   :  { %11 = vsyncpa [#allocation3], 0  ;;  %s983_s0 = inlined_call_operand.vmem [shape: f32[4,256], index: 0, kind: input, shape index: {}]   ;;  %s984_s1 = inlined_call_operand.vmem [shape: f32[32,4], index: 1, kind: input, shape index: {}]   ;;  %s985_s2 = inlined_call_operand.vmem [shape: f32[32,1], index: 2, kind: input, shape index: {}]   ;;  %s986_s3 = inlined_call_operand.vmem [shape: f32[4,32], index: 3, kind: input, shape index: {}]   ;;  %s987_s4 = inlined_call_operand.vmem [shape: f32[4,1], index: 4, kind: input, shape index: {}]   ;;  %s988_s5 = inlined_call_operand.vmem [shape: f32[4,4], index: 5, kind: input, shape index: {}]   ;;  %s989_s6 = inlined_call_operand.hbm [shape: f32[4,256], index: 6, kind: output, shape index: {}]  }
   0x1   :  { %13 = vsyncpa [#allocation3 + $0x1], 0  ;;  %s847_s21 = smov 0   ;;  %s849_s22 = smov 0  }
   0x2   :  { %s851_s23 = smov 0   ;;  %s853_s24 = smov 0  }
   0x3 LB: > { %s868_s25 = sadd.s32 4294967295, %s806_s24   ;;  %s638_s26 = sadd.s32 4294967294, %s806_s24   ;;  %s806_s24 = sphi %s853_s24, %s995_s24   ;;  %s802_s23 = sphi %s851_s23, %s994_s23   ;;  %s798_s22 = sphi %s849_s22, %s993_s22   ;;  %s794_s21 = sphi %s847_s21, %s992_s21  }
   0x4   : > { %s872_s27 = sadd.s32 1, %s806_s24   ;;  %s157_s28 = sadd.s32 1, %s802_s23 }
   0x5   : > { %s154_s29 = ssub.s32 %s806_s24, %s872_s27  ;;  %p167_p0 = scmp.ne.s32.totalorder %s802_s23, %s798_s22 }
   0x6   : > { %p155_p1 = scmp.eq.s32.totalorder %s154_s29, 0  ;;  %p168_p2 = scmp.eq.s32.totalorder %s868_s25, 1 }
   0x7   : > { %p173_p3 = scmp.ne.s32.totalorder %s798_s22, %s794_s21  ;;  %p174_p4 = scmp.eq.s32.totalorder %s638_s26, 1 }
   0x8   : > { %s883_s30 = scalar_select %p155_p1, %s802_s23, %s157_s28  }
   0x9   : > { %p885_p5 = por %p168_p2, %p167_p0  ;;  %p889_p6 = por %p174_p4, %p173_p3 }
   0xa   : > { %p641_p7 = scmp.ge.s32.totalorder %s806_s24, 1  ;;  %p214_p8 = scmp.lt.s32.totalorder %s806_s24, 3 }
   0xc   : > { %p215_p9 = pnand %p641_p7, %p214_p8 }
   0xd   : > { %p243_p10 = scmp.lt.s32.totalorder (!%p215_p9), %s868_s25, 1  ;;  %s653_s29 = sshll.u32 (!%p215_p9), %s868_s25, 6 }
   0xe   : > { %218 = sbr.rel (%p215_p9) target bundleno = 483 (0x1e3), region = 44 }
  0x13   : > { %v248_v0 = vld [vmem:[%s984_s1] sm:$0xff]  ;;  %vm276_vm0 = vcmask 31744   ;;  %v255_v1 = vld [vmem:[%s985_s2 + $0x18] sm:$0xff]  ;;  %s244_s13 = scalar_select %p243_p10, %s868_s25, 1  ;;  %v808_v2 = vmov 0   ;;  %v253_v3 = vld [vmem:[%s985_s2 + $0x8] sm:$0xff] }
  0x14   : > { %670 = vmatprep.mubr.msk.f32.mxu0 %vm276_vm0, %v248_v0  ;;  %734 = vset.pattern.permute.xlu0 %v808_v2  ;;  %vm289_vm1 = vcmask 1043456   ;;  %v254_v4 = vld [vmem:[%s985_s2 + $0x10] sm:$0xff]  ;;  %v252_v5 = vld [vmem:[%s985_s2] sm:$0xff]  ;;  %v249_v7 = vld [vmem:[%s984_s1 + $0x8] sm:$0xff]  ;;  %v809_v12 = vmov 0.0   ;;  %vm810_vm2 = vmmov 0  }
  0x15   : > { %735 = vset.pattern.permute.xlu1 %v808_v2  ;;  %273 = vperm.xlu0 %734, %v255_v1   ;;  %s643_s16 = sshll.u32 %s244_s13, 2  ;;  %v250_v8 = vld [vmem:[%s984_s1 + $0x10] sm:$0xff]  ;;  %v383_v9 = vld [vmem:[%s987_s4] sm:$0xf]  ;;  %v251_v10 = vld [vmem:[%s984_s1 + $0x18] sm:$0xff]  ;;  %vm389_vm3 = vcmask 261120   ;;  %s948_s13 = scalar_lea.hbm %s989_s6, %s653_s29 }
  0x16   : > { %263 = vperm.xlu1 %735, %v253_v3   ;;  %s246_s26 = scalar_lea.vmem %s983_s0, %s643_s16  ;;  %v463_v11 = vld [vmem:[%s988_s5] sm:$0xf]  ;;  %676 = vmatprep.subr.mxu1 %v809_v12  ;;  %s811_s25 = smov [#allocation2]  }
  0x17   : > { %v247_v6 = vld [vmem:[%s246_s26] sm:$0xf]  ;;  %684 = vmatprep.mubr.msk.f32.mxu1 %vm810_vm2, %v809_v12  ;;  %s240_s26 = sand.u32 1, %s798_s22   ;;  %s750_s16 = sshll.u32 %s811_s25, 4  ;;  %s751_s16 = int_to_ptr.vmem [resolvable:$false] %s750_s16 }
  0x18   : > { %668 = vmatprep.subr.msk.mxu0 %vm289_vm1, %v247_v6  ;;  %v382_v28 = vld [vmem:[%s986_s3] sm:$0xf]  ;;  %s642_s28 = sshll.u32 %s240_s26, 2  ;;  %s566_s14 = scalar_lea.sflag [#allocation3], %s240_s26 }
  0x19   : > { %268 = vperm.xlu0 %734, %v254_v4   ;;  %669 = vmatpush3.msk.msra.mxu0 %vm289_vm1, %v247_v6  ;;  %s242_s9 = scalar_lea.vmem [#allocation2], %s642_s28  ;;  %s752_s17 = scalar_lea.vmem %s751_s16, 128 }
  0x1a   : > { %258 = vperm.xlu1 %735, %v252_v5   ;;  %671 = vmatmul.mubr.msk.f32.vlgmr.msra.gmra.mxu0 %vm276_vm0, %v249_v7  ;;  %s579_s10 = sshll.u32 %s242_s9, 4  ;;  %s580_s10 = int_to_ptr.vmem [resolvable:$true] %s579_s10 }
  0x1b   : > { %673 = vmatprep.mubr.msk.f32.mxu0 %vm276_vm0, %v250_v8  ;;  %687 = vmatprep.subr.mxu0 %v809_v12  ;;  %s746_s15 = scalar_lea.vmem %s580_s10, 64  ;;  %p753_p0 = scmp.lt.s32.totalorder %s580_s10, %s751_s16 }
  0x1c   : > { %688 = vmatpush3.msk.msra.mxu0 %vm289_vm1, %v247_v6  ;;  %p747_p11 = scmp.ne.s32.totalorder %s580_s10, %s746_s15  ;;  %p754_p1 = scmp.lt.s32.totalorder %s752_s17, %s746_s15 }
  0x1d   : > { %386 = vperm.xlu0 %734, %v383_v9  }
  0x1e   : > { %674 = vmatmul.mubr.msk.f32.gmra.mxu0 %vm276_vm0, %v251_v10  ;;  %p748_p12 = pnand %p747_p11, %p885_p5  ;;  %p755_p2 = por %p754_p1, %p753_p0 }
  0x1f   : > { %689 = vmatprep.mubr.msk.f32.mxu0 %vm810_vm2, %v809_v12 }
  0x20   : > { %p749_p13 = pneg %p748_p12 }
  0x22   : > { %690 = vmatmul.mubr.msk.f32.vlgmr.msra.gmra.mxu0 %vm276_vm0, %v463_v11  ;;  %p756_p3 = pnand %p755_p2, %p749_p13 }
  0x90   : > { %v274_v13 = vpop.permute.xlu0 %273 }
  0x91   : > { %v264_v14 = vpop.permute.xlu1 %263 }
  0x94   : > { %v269_v18 = vpop.permute.xlu0 %268 }
  0x95   : > { %v259_v20 = vpop.permute.xlu1 %258 }
  0x98   : > { %v387_v39 = vpop.permute.xlu0 %386 }
  0xda   : > { %v672_v15 = vpop.f32.mrf.mxu0 }
  0xdb   : > { %v365_v22 = vadd.f32 %v672_v15, %v264_v14 }
  0xdc   : > { %v359_v16 = vpop.f32.mrf.mxu0 }
  0xdd   : > { %v360_v24 = vadd.f32 %v359_v16, %v259_v20 }
  0xde   : > { %v675_v17 = vpop.f32.mrf.mxu0 }
  0xdf   : > { %v375_v19 = vadd.f32 %v675_v17, %v274_v13 }
  0xe0   : > { %v369_v21 = vpop.f32.mrf.mxu0 }
  0xe1   : > { %736 = vtanh.f32 %v375_v19  ;;  %v370_v23 = vadd.f32 %v369_v21, %v269_v18 }
  0xe2   : > { %v533_v30 = vpop.f32.mrf.mxu0 }
  0xe3   : > { %738 = vtanh.f32 %v370_v23  ;;  %v546_v32 = vmul.f32 %v533_v30, %v533_v30 }
  0xe4   : > { %740 = vtanh.f32 %v365_v22  ;;  %v691_v31 = vpop.f32.mrf.mxu0 }
  0xe5   : > { %742 = vtanh.f32 %v360_v24  ;;  %v547_v33 = vsel %vm289_vm1, %v546_v32, 0.0 }
  0xe6   : > { %v548_v34 = vrot.slane %v547_v33, 4 }
  0xe8   : > { %v549_v35 = vadd.f32 %v548_v34, %v547_v33 }
  0xea   : > { %v550_v36 = vrot.slane %v549_v35, 2 }
  0xec   : > { %v551_v37 = vadd.f32 %v550_v36, %v549_v35 }
  0xee   : > { %v737_v25 = vpop.eup %736  ;;  %v552_v38 = vrot.slane %v551_v37, 1 }
  0xef   : > { %677 = vmatpush3.msra.mxu1 %v737_v25 }
  0xf0   : > { %v739_v26 = vpop.eup %738  ;;  %678 = vmatprep.subr.mxu1 %v809_v12  ;;  %v553_v42 = vadd.f32 %v552_v38, %v551_v37 }
  0xf1   : > { %679 = vmatpush3.msra.mxu1 %v739_v26  ;;  %v741_v27 = vpop.eup %740 }
  0xf2   : > { %680 = vmatprep.subr.mxu1 %v809_v12  ;;  %v743_v29 = vpop.eup %742  ;;  %744 = vrcp.f32 %v553_v42 }
  0xf3   : > { %681 = vmatpush3.msra.mxu1 %v741_v27 }
  0xf4   : > { %682 = vmatprep.subr.mxu1 %v809_v12 }
  0xf5   : > { %683 = vmatpush3.msra.mxu1 %v743_v29 }
  0xf6   : > { %685 = vmatmul.mubr.msk.f32.vlgmr.msra.gmra.mxu1 %vm389_vm3, %v382_v28 }
  0xff   : > { %v745_v53 = vpop.eup %744 }
 0x1b6   : > { %v459_v40 = vpop.f32.mrf.mxu1 }
 0x1b7   : > { %v460_v41 = vadd.f32 %v459_v40, %v387_v39 }
 0x1b8   : > { %v686_v43 = vpop.f32.mrf.mxu1 }
 0x1b9   : > { %v537_v44 = vmul.f32 %v533_v30, %v460_v41 }
 0x1bb   : > { %v538_v45 = vsel %vm289_vm1, %v537_v44, 0.0 }
 0x1bc   : > { %v539_v46 = vrot.slane %v538_v45, 4 }
 0x1be   : > { %v540_v47 = vadd.f32 %v539_v46, %v538_v45 }
 0x1c0   : > { %v541_v48 = vrot.slane %v540_v47, 2 }
 0x1c2   : > { %v542_v49 = vadd.f32 %v541_v48, %v540_v47 }
 0x1c4   : > { %v543_v50 = vrot.slane %v542_v49, 1 }
 0x1c6   : > { %v544_v51 = vadd.f32 %v543_v50, %v542_v49 }
 0x1c8   : > { %v545_v52 = vmax.f32 %v544_v51, 0.0 }
 0x1ca   : > { %v555_v54 = vmul.f32 %v745_v53, %v545_v52 }
 0x1cc   : > { %v556_v55 = vmul.f32 %v555_v54, %v533_v30 }
 0x1ce   : > { %v557_v56 = vsub.f32 %v460_v41, %v556_v55 }
 0x1d0   : > { %vm558_vm4 = vcmp.ne.f32.partialorder %v557_v56, %v557_v56 }
 0x1d1   : > { %v559_v57 = vsel %vm558_vm4, 0.0, %v557_v56 }
 0x1d2   : > { %vm560_vm5 = vcmp.eq.f32.partialorder %v559_v57, inf }
 0x1d3   : > { %v561_v58 = vsel %vm560_vm5, 3.4028235e+38, %v559_v57 }
 0x1d4   : > { %vm562_vm6 = vcmp.eq.f32.partialorder %v561_v58, -inf }
 0x1d5   : > { %v563_v59 = vsel %vm562_vm6, -3.4028235e+38, %v561_v58 }
 0x1d6   : > { %564 = vst [vmem:[%s242_s9] sm:$0xf] %v563_v59 }
 0x1d7   : > { %759 = shalt.err (!%p756_p3)
}
 0x1d8   : > { %s760_s18 = scalar_lea.hbm %s948_s13, 64  ;;  %s764_s26 = scalar_lea.hbm %s989_s6, 128 }
 0x1d9   : > { %p761_p4 = scmp.ne.s32.totalorder %s948_s13, %s760_s18  ;;  %p765_p9 = scmp.lt.s32.totalorder %s948_s13, %s989_s6 }
 0x1da   : > { %p766_p10 = scmp.lt.s32.totalorder %s764_s26, %s760_s18 }
 0x1db   : > { %p762_p7 = pnand %p761_p4, %p885_p5 }
 0x1dc   : > { %p767_p11 = por %p766_p10, %p765_p9 }
 0x1dd   : > { %p763_p8 = pneg %p762_p7 }
 0x1df   : > { %p768_p12 = pnand %p767_p11, %p763_p8 }
 0x1e1   : > { %771 = shalt.err (!%p768_p12)
}
 0x1e2   : > { %692 = dma.vmem_to_hbm [thread:$0]  (%p885_p5), %s580_s10, 64, %s948_s13, %s566_s14  }
 0x1e3 PF: > { %p698_p13 = scmp.ge.s32.totalorder %s806_s24, 2  ;;  %s591_s9 = sand.u32 1, %s794_s21  }
 0x1e4   : > { %s592_s11 = scalar_lea.sflag [#allocation3], %s591_s9 }
 0x1e5   : > { %p695_p0 = pnand %p698_p13, %p889_p6 }
 0x1e7   : > { %p696_p1 = pneg %p695_p0 }
 0x1e9   : > { %789 = dma.done.wait (%p696_p1), %s592_s11, 64  }
 0x1ea   : > { %791 = vsyncadd (%p696_p1), %s592_s11, 4294967232  ;;  %p16_p2 = scmp.ge.s32.totalorder %s872_s27, 4   ;;  %s992_s21 = smov %s798_s22 }
 0x1eb   : > { %s993_s22 = smov %s802_s23  ;;  %s994_s23 = smov %s883_s30 }
 0x1ec   : > { %s995_s24 = smov %s872_s27  ;;  %18 = sbr.rel (!%p16_p2) target bundleno = 3 (0x3), region = 79 }
 0x1f1   :  { %597 = vsyncpa [#allocation3], 1 }
 0x1f2   :  { %599 = vsyncpa [#allocation3 + $0x1], 1 }

</bundles_post_ra>
